<compile_context>
chip_gen: v6e
topology: v6e:2x2x1
jax: 0.10.0
libtpu: 0.0.40
codegen_flags: <defaults>
</compile_context>

<pallas_src>
import jax
import jax.numpy as jnp
from jax.experimental import pallas as pl
from jax.experimental.pallas import tpu as pltpu


_LANE = 128          # lane width of a vreg row
_ROW_TILE = 1024     # sublane-rows per grid step -> 128K pixels / 1.5 MiB f32 per block


def _rgb_to_ycbcr_kernel(img_ref, out_ref):
    # img_ref / out_ref: (1, 3, ts, 128) VMEM tiles — one batch element,
    # all 3 channels, a lane-dense chunk of pixels.
    r = img_ref[0, 0, :, :].astype(jnp.float32)
    g = img_ref[0, 1, :, :].astype(jnp.float32)
    b = img_ref[0, 2, :, :].astype(jnp.float32)

    y = 0.299 * r + 0.587 * g + 0.114 * b
    cb = (b - y) * 0.564 + 0.5
    cr = (r - y) * 0.713 + 0.5

    odt = out_ref.dtype
    out_ref[0, 0, :, :] = y.astype(odt)
    out_ref[0, 1, :, :] = cb.astype(odt)
    out_ref[0, 2, :, :] = cr.astype(odt)


def rgb_to_ycbcr(image: jax.Array) -> jax.Array:
    """image: (*, 3, H, W) float array -> (*, 3, H, W) YCbCr."""
    if image.ndim < 3 or image.shape[-3] != 3:
        raise ValueError(
            "Input size must have a shape of (*, 3, H, W). Got {}".format(image.shape)
        )

    lead = image.shape[:-3]
    H, W = image.shape[-2], image.shape[-1]
    P = H * W

    # Flatten leading batch dims and the spatial dims (free for contiguous NCHW).
    x = image.reshape((-1, 3, P))
    B = x.shape[0]

    # Pad the pixel axis up to a multiple of the 128-lane width (only needed for
    # awkward H*W; common image sizes already divide 128).
    P_pad = pl.cdiv(P, _LANE) * _LANE
    if P_pad != P:
        x = jnp.pad(x, ((0, 0), (0, 0), (0, P_pad - P)))

    rows = P_pad // _LANE
    x = x.reshape((B, 3, rows, _LANE))

    # Row-tile: multiple of 8 sublanes, or the full row extent for tiny images.
    ts = min(_ROW_TILE, rows)
    grid = (B, pl.cdiv(rows, ts))

    out = pl.pallas_call(
        _rgb_to_ycbcr_kernel,
        out_shape=jax.ShapeDtypeStruct((B, 3, rows, _LANE), x.dtype),
        grid_spec=pltpu.PrefetchScalarGridSpec(
            num_scalar_prefetch=0,
            grid=grid,
            in_specs=[pl.BlockSpec((1, 3, ts, _LANE), lambda b, i: (b, 0, i, 0))],
            out_specs=pl.BlockSpec((1, 3, ts, _LANE), lambda b, i: (b, 0, i, 0)),
        ),
        compiler_params=pltpu.CompilerParams(
            dimension_semantics=("parallel", "parallel"),
        ),
    )(x)

    out = out.reshape((B, 3, P_pad))
    if P_pad != P:
        out = out[..., :P]
    return out.reshape(lead + (3, H, W))


def _reference(image: jax.Array) -> jax.Array:
    r = image[..., 0, :, :]
    g = image[..., 1, :, :]
    b = image[..., 2, :, :]
    delta = 0.5
    y = 0.299 * r + 0.587 * g + 0.114 * b
    cb = (b - y) * 0.564 + delta
    cr = (r - y) * 0.713 + delta
    return jnp.stack([y, cb, cr], axis=-3)


if __name__ == "__main__":
    key = jax.random.PRNGKey(0)

    # Main test: (2, 3, 16, 16) f32.
    x = jax.random.uniform(key, (2, 3, 16, 16), dtype=jnp.float32)
    out = jax.block_until_ready(rgb_to_ycbcr(x))
    ref = _reference(x)
    assert out.shape == x.shape, (out.shape, x.shape)
    assert jnp.allclose(out, ref, atol=1e-6, rtol=1e-6), "mismatch vs reference"

    # Awkward spatial size (H*W not a multiple of 128) exercises the pad path.
    x2 = jax.random.uniform(jax.random.PRNGKey(1), (2, 3, 4, 5), dtype=jnp.float32)
    out2 = jax.block_until_ready(rgb_to_ycbcr(x2))
    ref2 = _reference(x2)
    assert out2.shape == x2.shape, (out2.shape, x2.shape)
    assert jnp.allclose(out2, ref2, atol=1e-6, rtol=1e-6), "mismatch vs reference (pad path)"

    print("KERNEL_OK")
</pallas_src>

<mosaic_0001>
module attributes {stable_mosaic.version = 11 : i64} {
  func.func @_rgb_to_ycbcr_kernel(%arg0: i32, %arg1: i32, %arg2: memref<1x3x2x128xf32, #tpu.memory_space<vmem>>, %arg3: memref<1x3x2x128xf32, #tpu.memory_space<vmem>>) attributes {dimension_semantics = [#tpu.dimension_semantics<parallel>, #tpu.dimension_semantics<parallel>], iteration_bounds = array<i64: 2, 1>, scalar_prefetch = 0 : i64, scratch_operands = 0 : i64, tpu.core_type = #tpu.core_type<tc>, window_params = [{transform_indices = @transform_0, window_bounds = array<i64: 1, 3, 2, 128>}, {transform_indices = @transform_1, window_bounds = array<i64: 1, 3, 2, 128>}]} {
    %c0 = arith.constant 0 : index
    %c0_0 = arith.constant 0 : index
    %c0_1 = arith.constant 0 : index
    %c0_2 = arith.constant 0 : index
    %0 = vector.load %arg2[%c0, %c0_0, %c0_1, %c0_2] : memref<1x3x2x128xf32, #tpu.memory_space<vmem>>, vector<1x1x2x128xf32>
    %1 = vector.shape_cast %0 : vector<1x1x2x128xf32> to vector<2x128xf32>
    %c0_3 = arith.constant 0 : index
    %c1 = arith.constant 1 : index
    %c0_4 = arith.constant 0 : index
    %c0_5 = arith.constant 0 : index
    %2 = vector.load %arg2[%c0_3, %c1, %c0_4, %c0_5] : memref<1x3x2x128xf32, #tpu.memory_space<vmem>>, vector<1x1x2x128xf32>
    %3 = vector.shape_cast %2 : vector<1x1x2x128xf32> to vector<2x128xf32>
    %c0_6 = arith.constant 0 : index
    %c2 = arith.constant 2 : index
    %c0_7 = arith.constant 0 : index
    %c0_8 = arith.constant 0 : index
    %4 = vector.load %arg2[%c0_6, %c2, %c0_7, %c0_8] : memref<1x3x2x128xf32, #tpu.memory_space<vmem>>, vector<1x1x2x128xf32>
    %5 = vector.shape_cast %4 : vector<1x1x2x128xf32> to vector<2x128xf32>
    %cst = arith.constant 2.990000e-01 : f32
    %6 = vector.broadcast %cst : f32 to vector<2x128xf32>
    %7 = arith.mulf %6, %1 : vector<2x128xf32>
    %cst_9 = arith.constant 5.870000e-01 : f32
    %8 = vector.broadcast %cst_9 : f32 to vector<2x128xf32>
    %9 = arith.mulf %8, %3 : vector<2x128xf32>
    %10 = arith.addf %7, %9 : vector<2x128xf32>
    %cst_10 = arith.constant 1.140000e-01 : f32
    %11 = vector.broadcast %cst_10 : f32 to vector<2x128xf32>
    %12 = arith.mulf %11, %5 : vector<2x128xf32>
    %13 = arith.addf %10, %12 : vector<2x128xf32>
    %14 = arith.subf %5, %13 : vector<2x128xf32>
    %cst_11 = arith.constant 5.640000e-01 : f32
    %15 = vector.broadcast %cst_11 : f32 to vector<2x128xf32>
    %16 = arith.mulf %14, %15 : vector<2x128xf32>
    %cst_12 = arith.constant 5.000000e-01 : f32
    %17 = vector.broadcast %cst_12 : f32 to vector<2x128xf32>
    %18 = arith.addf %16, %17 : vector<2x128xf32>
    %19 = arith.subf %1, %13 : vector<2x128xf32>
    %cst_13 = arith.constant 0.712999999 : f32
    %20 = vector.broadcast %cst_13 : f32 to vector<2x128xf32>
    %21 = arith.mulf %19, %20 : vector<2x128xf32>
    %cst_14 = arith.constant 5.000000e-01 : f32
    %22 = vector.broadcast %cst_14 : f32 to vector<2x128xf32>
    %23 = arith.addf %21, %22 : vector<2x128xf32>
    %c0_15 = arith.constant 0 : index
    %c0_16 = arith.constant 0 : index
    %c0_17 = arith.constant 0 : index
    %c0_18 = arith.constant 0 : index
    %24 = vector.load %arg3[%c0_15, %c0_16, %c0_17, %c0_18] : memref<1x3x2x128xf32, #tpu.memory_space<vmem>>, vector<1x1x2x128xf32>
    %25 = vector.shape_cast %24 : vector<1x1x2x128xf32> to vector<2x128xf32>
    %26 = vector.shape_cast %13 : vector<2x128xf32> to vector<1x1x2x128xf32>
    tpu.vector_store %arg3[%c0_15, %c0_16, %c0_17, %c0_18], %26 {strides = array<i32>} : memref<1x3x2x128xf32, #tpu.memory_space<vmem>>, vector<1x1x2x128xf32>,
    %c0_19 = arith.constant 0 : index
    %c1_20 = arith.constant 1 : index
    %c0_21 = arith.constant 0 : index
    %c0_22 = arith.constant 0 : index
    %27 = vector.load %arg3[%c0_19, %c1_20, %c0_21, %c0_22] : memref<1x3x2x128xf32, #tpu.memory_space<vmem>>, vector<1x1x2x128xf32>
    %28 = vector.shape_cast %27 : vector<1x1x2x128xf32> to vector<2x128xf32>
    %29 = vector.shape_cast %18 : vector<2x128xf32> to vector<1x1x2x128xf32>
    tpu.vector_store %arg3[%c0_19, %c1_20, %c0_21, %c0_22], %29 {strides = array<i32>} : memref<1x3x2x128xf32, #tpu.memory_space<vmem>>, vector<1x1x2x128xf32>,
    %c0_23 = arith.constant 0 : index
    %c2_24 = arith.constant 2 : index
    %c0_25 = arith.constant 0 : index
    %c0_26 = arith.constant 0 : index
    %30 = vector.load %arg3[%c0_23, %c2_24, %c0_25, %c0_26] : memref<1x3x2x128xf32, #tpu.memory_space<vmem>>, vector<1x1x2x128xf32>
    %31 = vector.shape_cast %30 : vector<1x1x2x128xf32> to vector<2x128xf32>
    %32 = vector.shape_cast %23 : vector<2x128xf32> to vector<1x1x2x128xf32>
    tpu.vector_store %arg3[%c0_23, %c2_24, %c0_25, %c0_26], %32 {strides = array<i32>} : memref<1x3x2x128xf32, #tpu.memory_space<vmem>>, vector<1x1x2x128xf32>,
    return
  }
  func.func @transform_0(%arg0: i32, %arg1: i32) -> (i32, i32, i32, i32) {
    %c0_i32 = arith.constant 0 : i32
    %c0_i32_0 = arith.constant 0 : i32
    %c0_i32_1 = arith.constant 0 : i32
    return %arg0, %c0_i32, %arg1, %c0_i32_0 : i32, i32, i32, i32
  }
  func.func @transform_1(%arg0: i32, %arg1: i32) -> (i32, i32, i32, i32) {
    %c0_i32 = arith.constant 0 : i32
    %c0_i32_0 = arith.constant 0 : i32
    %c0_i32_1 = arith.constant 0 : i32
    return %arg0, %c0_i32, %arg1, %c0_i32_0 : i32, i32, i32, i32
  }
}

</mosaic_0001>

<bundles_post_ra>
// kernel: tpu_custom_call.1
= control target key start
LH: loop header
LB: loop body
LE: loop exit
PB: predicated region body
PF: predicated region fallthrough
CT: control target
= control target key end

     0   :  { %6 = vsyncpa [#allocation3], 0  ;;  %s628_s0 = inlined_call_operand.hbm [shape: f32[2,3,2,128], index: 0, kind: input, shape index: {}]   ;;  %s629_s1 = inlined_call_operand.hbm [shape: f32[2,3,2,128], index: 1, kind: output, shape index: {}]  }
   0x1   :  { %8 = vsyncpa [#allocation3 + $0x1], 0 }
   0x2   :  { %9 = vsyncpa [#allocation4], 0 }
   0x3   :  { %11 = vsyncpa [#allocation4 + $0x1], 0  ;;  %s482_s6 = smov 0   ;;  %s484_s7 = smov 0  }
   0x4   :  { %s486_s8 = smov 0   ;;  %s488_s9 = smov 0  }
   0x5   :  { %s490_s10 = smov 0   ;;  %s492_s11 = smov 0  }
   0x6 LB: > { %s273_s12 = sadd.s32 4294967295, %s464_s11   ;;  %s274_s13 = sadd.s32 4294967294, %s464_s11   ;;  %s464_s11 = sphi %s492_s11, %s17_s11   ;;  %s460_s10 = sphi %s490_s10, %s640_s10   ;;  %s456_s9 = sphi %s488_s9, %s639_s9   ;;  %s452_s8 = sphi %s486_s8, %s638_s8   ;;  %s448_s7 = sphi %s484_s7, %s637_s7   ;;  %s444_s6 = sphi %s482_s6, %s636_s6  }
   0x7   : > { %s29_s14 = sadd.s32 1, %s460_s10  ;;  %s38_s15 = sadd.s32 1, %s452_s8 }
   0x8   : > { %p31_p0 = scmp.ge.s32.totalorder %s29_s14, 2  ;;  %p45_p1 = scmp.ne.s32.totalorder %s452_s8, %s448_s7 }
   0x9   : > { %p46_p2 = scmp.eq.s32.totalorder %s464_s11, 0  ;;  %p51_p3 = scmp.ne.s32.totalorder %s448_s7, %s444_s6 }
   0xa   : > { %s642_s14 = smov (%p31_p0, %s29_s14), 0  ;;  %p52_p5 = scmp.eq.s32.totalorder %s273_s12, 0 }
   0xb   : > { %p523_p4 = por %p46_p2, %p45_p1  ;;  %s33_s17 = ssub.s32 %s460_s10, %s642_s14 }
   0xc   : > { %p77_p6 = scmp.eq.s32.totalorder %s273_s12, 1  ;;  %p36_p7 = scmp.eq.s32.totalorder %s33_s17, 0 }
   0xd   : > { %p529_p8 = por %p52_p5, %p51_p3  ;;  %p83_p10 = scmp.eq.s32.totalorder %s274_s13, 1 }
   0xe   : > { %p533_p9 = por %p77_p6, %p45_p1  ;;  %p302_p13 = scmp.lt.s32.totalorder %s464_s11, 2 }
   0xf   : > { %s538_s20 = scalar_select %p36_p7, %s452_s8, %s38_s15  }
  0x10   : > { %p540_p11 = por %p83_p10, %p51_p3  ;;  %s103_s22 = sand.u32 1, %s452_s8  }
  0x11   : > { %s286_s23 = smul.u32 6, %s103_s22  ;;  %p550_p0 = pnand %p302_p13, %p523_p4 }
  0x12   : > { %s287_s24 = smul.u32 96, %s460_s10  ;;  %p278_p1 = scmp.ge.s32.totalorder %s464_s11, 1 }
  0x13   : > { %s107_s29 = scalar_lea.vmem [#allocation2], %s286_s23  ;;  %s104_s2 = scalar_lea.sflag [#allocation3], %s103_s22 }
  0x14   : > { %s114_s28 = scalar_lea.hbm %s628_s0, %s287_s24  ;;  %s115_s30 = sshll.u32 %s107_s29, 4  ;;  %s116_s30 = int_to_ptr.vmem [resolvable:$true] %s115_s30 }
  0x15   : > { %p358_p2 = pneg %p550_p0  ;;  %s369_s3 = scalar_lea.vmem %s116_s30, 96 }
  0x16   : > { %p370_p3 = scmp.ne.s32.totalorder %s116_s30, %s369_s3  ;;  %s466_s4 = smov [#allocation2]  }
  0x17   : > { %s374_s5 = sshll.u32 %s466_s4, 4  ;;  %s375_s5 = int_to_ptr.vmem [resolvable:$false] %s374_s5 }
  0x18   : > { %p372_p5 = pnand %p370_p3, %p358_p2  ;;  %s376_s12 = scalar_lea.vmem %s375_s5, 192 }
  0x19   : > { %p377_p4 = scmp.lt.s32.totalorder %s116_s30, %s375_s5  ;;  %p378_p7 = scmp.lt.s32.totalorder %s376_s12, %s369_s3 }
  0x1a   : > { %p373_p6 = pneg %p372_p5 }
  0x1b   : > { %p379_p10 = por %p378_p7, %p377_p4 }
  0x1d   : > { %p380_p13 = pnand %p379_p10, %p373_p6 }
  0x1f   : > { %383 = shalt.err (!%p380_p13)
}
  0x20   : > { %s467_s13 = smov 32   ;;  %s468_s15 = smov 2  }
  0x21   : > { %297 = dma.hbm_to_vmem [thread:$0]  (!%p550_p0), %s114_s28, 96, %s116_s30, %s104_s2, %s467_s13, %s467_s13, %s468_s15  }
  0x22   : > { %p123_p12 = scmp.lt.s32.totalorder %s464_s11, 3 }
  0x24   : > { %p124_p2 = pnand %p278_p1, %p123_p12 }
  0x25   : > { %s566_s16 = sand.u32 (!%p124_p2), 1, %s448_s7  }
  0x26   : > { %127 = sbr.rel (%p124_p2) target bundleno = 71 (0x47), region = 24  ;;  %s130_s22 = scalar_lea.sflag (!%p124_p2), [#allocation3], %s566_s16 }
  0x27   : > { %s288_s17 = smul.u32 (!%p124_p2), 6, %s566_s16 }
  0x29   : > { %s133_s23 = scalar_lea.vmem (!%p124_p2), [#allocation2], %s288_s17 }
  0x2b   : > { %435 = dma.done.wait (%p529_p8), %s130_s22, 96  }
  0x2c   : > { %437 = vsyncadd (%p529_p8), %s130_s22, 4294967200  ;;  %v152_v0 = vld [vmem:[%s133_s23] sm:$0x3]  ;;  %v279_v1 = vld [vmem:[%s133_s23 + $0x2] sm:$0x3]  ;;  %s151_s24 = scalar_lea.vmem [#allocation5], %s288_s17 }
  0x2d   : > { %v280_v2 = vld [vmem:[%s133_s23 + $0x4] sm:$0x3]  ;;  %v157_v3 = vmul.f32 0.299, %v152_v0  ;;  %v158_v4 = vmul.f32 0.587, %v279_v1 }
  0x2e   : > { %v160_v5 = vmul.f32 0.114, %v280_v2  ;;  %s188_s25 = sshll.u32 %s151_s24, 4  ;;  %s289_s26 = smul.u32 96, %s456_s9  ;;  %s575_s25 = int_to_ptr.vmem [resolvable:$true] %s188_s25 }
  0x2f   : > { %v159_v6 = vadd.f32 %v158_v4, %v157_v3  ;;  %s174_s29 = scalar_lea.sflag [#allocation4], %s566_s16  ;;  %s384_s30 = scalar_lea.vmem %s575_s25, 96 }
  0x30   : > { %s580_s28 = scalar_lea.hbm %s629_s1, %s289_s26  ;;  %p385_p8 = scmp.ne.s32.totalorder %s575_s25, %s384_s30 }
  0x31   : > { %v161_v7 = vadd.f32 %v160_v5, %v159_v6  ;;  %s469_s9 = smov [#allocation5]  }
  0x32   : > { %p386_p12 = pnand %p385_p8, %p533_p9  ;;  %s388_s2 = sshll.u32 %s469_s9, 4  ;;  %s389_s2 = int_to_ptr.vmem [resolvable:$false] %s388_s2 }
  0x33   : > { %168 = vst [vmem:[%s151_s24] sm:$0x3] %v161_v7  ;;  %v162_v8 = vsub.f32 %v280_v2, %v161_v7  ;;  %v165_v9 = vsub.f32 %v152_v0, %v161_v7  ;;  %s390_s3 = scalar_lea.vmem %s389_s2, 192  ;;  %p391_p1 = scmp.lt.s32.totalorder %s575_s25, %s389_s2 }
  0x34   : > { %p387_p0 = pneg %p386_p12  ;;  %p392_p3 = scmp.lt.s32.totalorder %s390_s3, %s384_s30 }
  0x35   : > { %v163_v10 = vmul.f32 0.564, %v162_v8  ;;  %v166_v11 = vmul.f32 0.713, %v165_v9 }
  0x36   : > { %p393_p5 = por %p392_p3, %p391_p1 }
  0x37   : > { %v164_v12 = vadd.f32 0.5, %v163_v10  ;;  %v167_v13 = vadd.f32 0.5, %v166_v11 }
  0x38   : > { %p394_p6 = pnand %p393_p5, %p387_p0 }
  0x39   : > { %281 = vst [vmem:[%s151_s24 + $0x2] sm:$0x3] %v164_v12  ;;  %282 = vst [vmem:[%s151_s24 + $0x4] sm:$0x3] %v167_v13 }
  0x3a   : > { %397 = shalt.err (!%p394_p6)
}
  0x3b   : > { %s398_s4 = scalar_lea.hbm %s580_s28, 96  ;;  %s402_s13 = scalar_lea.hbm %s629_s1, 192 }
  0x3c   : > { %p399_p4 = scmp.ne.s32.totalorder %s580_s28, %s398_s4  ;;  %p403_p13 = scmp.lt.s32.totalorder %s580_s28, %s629_s1 }
  0x3d   : > { %p404_p2 = scmp.lt.s32.totalorder %s402_s13, %s398_s4 }
  0x3e   : > { %p400_p7 = pnand %p399_p4, %p533_p9 }
  0x3f   : > { %p405_p8 = por %p404_p2, %p403_p13 }
  0x40   : > { %p401_p10 = pneg %p400_p7 }
  0x42   : > { %p406_p12 = pnand %p405_p8, %p401_p10 }
  0x44   : > { %409 = shalt.err (!%p406_p12)
}
  0x45   : > { %s470_s22 = smov 32   ;;  %s471_s23 = smov 2  }
  0x46   : > { %292 = dma.vmem_to_hbm [thread:$0]  (%p533_p9), %s575_s25, 96, %s580_s28, %s174_s29, %s470_s22, %s470_s22, %s471_s23  }
  0x47 PF: > { %s203_s24 = sand.u32 1, %s444_s6   ;;  %p635_p0 = scmp.ge.s32.totalorder %s464_s11, 2 }
  0x48   : > { %s204_s26 = scalar_lea.sflag [#allocation4], %s203_s24 }
  0x49   : > { %p299_p1 = pnand %p635_p0, %p540_p11 }
  0x4b   : > { %p300_p3 = pneg %p299_p1 }
  0x4d   : > { %439 = dma.done.wait (%p300_p3), %s204_s26, 96  }
  0x4e   : > { %441 = vsyncadd (%p300_p3), %s204_s26, 4294967200  ;;  %s17_s11 = sadd.s32 1, %s464_s11   ;;  %s636_s6 = smov %s448_s7 }
  0x4f   : > { %p14_p5 = scmp.ge.s32.totalorder %s17_s11, 4   ;;  %s637_s7 = smov %s452_s8 }
  0x50   : > { %s638_s8 = smov %s538_s20  ;;  %s639_s9 = smov %s460_s10 }
  0x51   : > { %s640_s10 = smov %s642_s14  ;;  %16 = sbr.rel (!%p14_p5) target bundleno = 6 (0x6), region = 73 }
  0x56   :  { %209 = vsyncpa [#allocation3], 1 }
  0x57   :  { %211 = vsyncpa [#allocation3 + $0x1], 1 }
  0x58   :  { %212 = vsyncpa [#allocation4], 1 }
  0x59   :  { %214 = vsyncpa [#allocation4 + $0x1], 1 }

</bundles_post_ra>
